<compile_context>
chip_gen: v5e
topology: v5e:2x2
jax: 0.10.0
libtpu: 0.0.40
codegen_flags: <defaults>
</compile_context>

<pallas_src>
from functools import partial

import jax
import jax.numpy as jnp
from jax.experimental import pallas as pl
from jax.experimental.pallas import tpu as pltpu


def _round_up(n, m):
    return ((n + m - 1) // m) * m


def _critic_kernel(x_ref, a_ref, w1x_ref, w1a_ref, b1_ref,
                   w2_ref, b2_ref, w3_ref, b3_ref, out_ref):
    # Layer 1: split-K matmul replaces the concat([x, a]) of the PyTorch model.
    h1 = jnp.dot(x_ref[...], w1x_ref[...], preferred_element_type=jnp.float32)
    h1 = h1 + jnp.dot(a_ref[...], w1a_ref[...],
                      preferred_element_type=jnp.float32)
    h1 = jnp.maximum(h1 + b1_ref[...], 0.0)           # bias + ReLU in f32

    # Layer 2 (feed MXU-friendly dtype into the dot, accumulate in f32).
    h1 = h1.astype(w2_ref.dtype)
    h2 = jnp.dot(h1, w2_ref[...], preferred_element_type=jnp.float32)
    h2 = jnp.maximum(h2 + b2_ref[...], 0.0)

    # Output layer: lane-dense [tb, 128] slab, real q lives in column 0.
    h2 = h2.astype(w3_ref.dtype)
    q = jnp.dot(h2, w3_ref[...], preferred_element_type=jnp.float32)
    out_ref[...] = (q + b3_ref[...]).astype(out_ref.dtype)


@partial(jax.jit, static_argnames=("block_b", "use_bf16"))
def critic_forward(x, a, params, *, block_b=256, use_bf16=True):
    """x: [B, state_dim], a: [B, action_dim] -> q: [B, 1] (float32)."""
    w1, b1, w2, b2, w3, b3 = params
    B, sd = x.shape
    _, ad = a.shape
    H = w1.shape[1]

    Hp = _round_up(H, 128)           # MXU/lane-friendly hidden width
    OUT_P = 128                      # lane-dense output slab width

    # ---- pad weights (exact: padded hidden units are identically zero) ----
    w1x = jnp.pad(w1[:sd, :], ((0, 0), (0, Hp - H)))
    w1a = jnp.pad(w1[sd:, :], ((0, 0), (0, Hp - H)))
    b1p = jnp.pad(b1, ((0, 0), (0, Hp - H)))
    w2p = jnp.pad(w2, ((0, Hp - H), (0, Hp - H)))
    b2p = jnp.pad(b2, ((0, 0), (0, Hp - H)))
    w3p = jnp.pad(w3, ((0, Hp - H), (0, OUT_P - 1)))
    b3p = jnp.pad(b3, ((0, 0), (0, OUT_P - 1)))

    cdt = jnp.bfloat16 if use_bf16 else jnp.float32
    w1x = w1x.astype(cdt)
    w1a = w1a.astype(cdt)
    w2c = w2p.astype(cdt)
    w3c = w3p.astype(cdt)

    # ---- batch tiling (sublane alignment: 8 for f32, 16 for bf16) ----
    align = 16 if use_bf16 else 8
    tb = min(block_b, _round_up(B, align))
    Bp = _round_up(B, tb)
    x_p = jnp.pad(x, ((0, Bp - B), (0, 0))).astype(cdt)
    a_p = jnp.pad(a, ((0, Bp - B), (0, 0))).astype(cdt)

    grid = (Bp // tb,)

    def resident(arr):               # weights/biases: same block every step
        return pl.BlockSpec(arr.shape, lambda i: (0, 0))

    def batched(feat):               # batch-tiled activations
        return pl.BlockSpec((tb, feat), lambda i: (i, 0))

    flops = 2 * Bp * (sd * Hp + ad * Hp + Hp * Hp + Hp * OUT_P)
    bytes_accessed = int(
        x_p.size * x_p.dtype.itemsize + a_p.size * a_p.dtype.itemsize
        + w1x.size * w1x.dtype.itemsize + w1a.size * w1a.dtype.itemsize
        + w2c.size * w2c.dtype.itemsize + w3c.size * w3c.dtype.itemsize
        + (b1p.size + b2p.size + b3p.size) * 4
        + Bp * OUT_P * 4)

    out = pl.pallas_call(
        _critic_kernel,
        out_shape=jax.ShapeDtypeStruct((Bp, OUT_P), jnp.float32),
        grid=grid,
        in_specs=[batched(sd), batched(ad),
                  resident(w1x), resident(w1a), resident(b1p),
                  resident(w2c), resident(b2p),
                  resident(w3c), resident(b3p)],
        out_specs=pl.BlockSpec((tb, OUT_P), lambda i: (i, 0)),
        compiler_params=pltpu.CompilerParams(
            dimension_semantics=("parallel",)),
        cost_estimate=pl.CostEstimate(flops=flops, transcendentals=0,
                                      bytes_accessed=bytes_accessed),
    )(x_p, a_p, w1x, w1a, b1p, w2c, b2p, w3c, b3p)

    return out[:B, :1]


def init_critic_params(key, state_dim, hidden_dim, action_dim):
    """torch.nn.Linear-style init (uniform +-1/sqrt(fan_in)).
    Weights stored pre-transposed as [in_features, out_features]."""
    k1, k2, k3, k4, k5, k6 = jax.random.split(key, 6)
    in1 = state_dim + action_dim

    def u(k, shape, fan_in):
        bound = 1.0 / jnp.sqrt(fan_in)
        return jax.random.uniform(k, shape, jnp.float32, -bound, bound)

    w1 = u(k1, (in1, hidden_dim), in1)
    b1 = u(k2, (1, hidden_dim), in1)
    w2 = u(k3, (hidden_dim, hidden_dim), hidden_dim)
    b2 = u(k4, (1, hidden_dim), hidden_dim)
    w3 = u(k5, (hidden_dim, 1), hidden_dim)
    b3 = u(k6, (1, 1), hidden_dim)
    return (w1, b1, w2, b2, w3, b3)


def critic_reference(x, a, params):
    """Pure-JAX f32 reference of the same forward pass."""
    w1, b1, w2, b2, w3, b3 = params
    xa = jnp.concatenate([x, a], axis=1)
    h1 = jnp.maximum(xa @ w1 + b1, 0.0)
    h2 = jnp.maximum(h1 @ w2 + b2, 0.0)
    return h2 @ w3 + b3


if __name__ == "__main__":
    B, state_dim, action_dim, hidden_dim = 8, 12, 4, 32

    key = jax.random.PRNGKey(0)
    kx, ka, kp = jax.random.split(key, 3)
    x = jax.random.normal(kx, (B, state_dim), jnp.float32)
    a = jax.random.normal(ka, (B, action_dim), jnp.float32)
    params = init_critic_params(kp, state_dim, hidden_dim, action_dim)

    q_ref = critic_reference(x, a, params)

    # Exact f32 path: must match the reference tightly.
    q_f32 = critic_forward(x, a, params, use_bf16=False)
    jax.block_until_ready(q_f32)
    assert q_f32.shape == (B, 1)
    assert jnp.allclose(q_f32, q_ref, atol=1e-5, rtol=1e-5)

    # bf16-into-MXU / f32-accumulate path: loose tolerance vs f32 reference.
    q_bf16 = critic_forward(x, a, params, use_bf16=True)
    jax.block_until_ready(q_bf16)
    assert q_bf16.shape == (B, 1)
    assert jnp.allclose(q_bf16, q_ref, atol=3e-2, rtol=3e-2)

    print("KERNEL_OK")
</pallas_src>

<mosaic_0001>
module attributes {stable_mosaic.version = 11 : i64} {
  func.func @_critic_kernel(%arg0: i32, %arg1: memref<8x12xf32, #tpu.memory_space<vmem>>, %arg2: memref<8x4xf32, #tpu.memory_space<vmem>>, %arg3: memref<12x128xf32, #tpu.memory_space<vmem>>, %arg4: memref<4x128xf32, #tpu.memory_space<vmem>>, %arg5: memref<1x128xf32, #tpu.memory_space<vmem>>, %arg6: memref<128x128xf32, #tpu.memory_space<vmem>>, %arg7: memref<1x128xf32, #tpu.memory_space<vmem>>, %arg8: memref<128x128xf32, #tpu.memory_space<vmem>>, %arg9: memref<1x128xf32, #tpu.memory_space<vmem>>, %arg10: memref<8x128xf32, #tpu.memory_space<vmem>>) attributes {dimension_semantics = [#tpu.dimension_semantics<parallel>], iteration_bounds = array<i64: 1>, scalar_prefetch = 0 : i64, scratch_operands = 0 : i64, tpu.core_type = #tpu.core_type<tc>, window_params = [{transform_indices = @transform_0, window_bounds = array<i64: 8, 12>}, {transform_indices = @transform_1, window_bounds = array<i64: 8, 4>}, {pipeline_mode = #tpu.pipeline_mode<synchronous>, transform_indices = @transform_2, window_bounds = array<i64: 12, 128>}, {pipeline_mode = #tpu.pipeline_mode<synchronous>, transform_indices = @transform_3, window_bounds = array<i64: 4, 128>}, {pipeline_mode = #tpu.pipeline_mode<synchronous>, transform_indices = @transform_4, window_bounds = array<i64: 1, 128>}, {pipeline_mode = #tpu.pipeline_mode<synchronous>, transform_indices = @transform_5, window_bounds = array<i64: 128, 128>}, {pipeline_mode = #tpu.pipeline_mode<synchronous>, transform_indices = @transform_6, window_bounds = array<i64: 1, 128>}, {pipeline_mode = #tpu.pipeline_mode<synchronous>, transform_indices = @transform_7, window_bounds = array<i64: 128, 128>}, {pipeline_mode = #tpu.pipeline_mode<synchronous>, transform_indices = @transform_8, window_bounds = array<i64: 1, 128>}, {transform_indices = @transform_9, window_bounds = array<i64: 8, 128>}]} {
    %c0 = arith.constant 0 : index
    %c0_0 = arith.constant 0 : index
    %0 = vector.load %arg1[%c0, %c0_0] : memref<8x12xf32, #tpu.memory_space<vmem>>, vector<8x12xf32>
    %c0_1 = arith.constant 0 : index
    %c0_2 = arith.constant 0 : index
    %1 = vector.load %arg3[%c0_1, %c0_2] : memref<12x128xf32, #tpu.memory_space<vmem>>, vector<12x128xf32>
    %cst = arith.constant dense<0.000000e+00> : vector<8x128xf32>
    %2 = tpu.matmul %0, %1, %cst {dimension_numbers = #tpu.dot_dimension_numbers<[1], [0], [0], [1], [0, 0, 1, 1], [], []>} : vector<8x12xf32>, vector<12x128xf32>, vector<8x128xf32> -> vector<8x128xf32>
    %c0_3 = arith.constant 0 : index
    %c0_4 = arith.constant 0 : index
    %3 = vector.load %arg2[%c0_3, %c0_4] : memref<8x4xf32, #tpu.memory_space<vmem>>, vector<8x4xf32>
    %c0_5 = arith.constant 0 : index
    %c0_6 = arith.constant 0 : index
    %4 = vector.load %arg4[%c0_5, %c0_6] : memref<4x128xf32, #tpu.memory_space<vmem>>, vector<4x128xf32>
    %cst_7 = arith.constant dense<0.000000e+00> : vector<8x128xf32>
    %5 = tpu.matmul %3, %4, %cst_7 {dimension_numbers = #tpu.dot_dimension_numbers<[1], [0], [0], [1], [0, 0, 1, 1], [], []>} : vector<8x4xf32>, vector<4x128xf32>, vector<8x128xf32> -> vector<8x128xf32>
    %6 = arith.addf %2, %5 : vector<8x128xf32>
    %c0_8 = arith.constant 0 : index
    %c0_9 = arith.constant 0 : index
    %7 = vector.load %arg5[%c0_8, %c0_9] : memref<1x128xf32, #tpu.memory_space<vmem>>, vector<1x128xf32>
    %8 = vector.broadcast %7 : vector<1x128xf32> to vector<8x128xf32>
    %9 = arith.addf %6, %8 : vector<8x128xf32>
    %cst_10 = arith.constant 0.000000e+00 : f32
    %10 = vector.broadcast %cst_10 : f32 to vector<8x128xf32>
    %11 = arith.maximumf %9, %10 : vector<8x128xf32>
    %c0_11 = arith.constant 0 : index
    %c0_12 = arith.constant 0 : index
    %12 = vector.load %arg6[%c0_11, %c0_12] : memref<128x128xf32, #tpu.memory_space<vmem>>, vector<128x128xf32>
    %cst_13 = arith.constant dense<0.000000e+00> : vector<8x128xf32>
    %13 = tpu.matmul %11, %12, %cst_13 {dimension_numbers = #tpu.dot_dimension_numbers<[1], [0], [0], [1], [0, 0, 1, 1], [], []>} : vector<8x128xf32>, vector<128x128xf32>, vector<8x128xf32> -> vector<8x128xf32>
    %c0_14 = arith.constant 0 : index
    %c0_15 = arith.constant 0 : index
    %14 = vector.load %arg7[%c0_14, %c0_15] : memref<1x128xf32, #tpu.memory_space<vmem>>, vector<1x128xf32>
    %15 = vector.broadcast %14 : vector<1x128xf32> to vector<8x128xf32>
    %16 = arith.addf %13, %15 : vector<8x128xf32>
    %cst_16 = arith.constant 0.000000e+00 : f32
    %17 = vector.broadcast %cst_16 : f32 to vector<8x128xf32>
    %18 = arith.maximumf %16, %17 : vector<8x128xf32>
    %c0_17 = arith.constant 0 : index
    %c0_18 = arith.constant 0 : index
    %19 = vector.load %arg8[%c0_17, %c0_18] : memref<128x128xf32, #tpu.memory_space<vmem>>, vector<128x128xf32>
    %cst_19 = arith.constant dense<0.000000e+00> : vector<8x128xf32>
    %20 = tpu.matmul %18, %19, %cst_19 {dimension_numbers = #tpu.dot_dimension_numbers<[1], [0], [0], [1], [0, 0, 1, 1], [], []>} : vector<8x128xf32>, vector<128x128xf32>, vector<8x128xf32> -> vector<8x128xf32>
    %c0_20 = arith.constant 0 : index
    %c0_21 = arith.constant 0 : index
    %21 = vector.load %arg9[%c0_20, %c0_21] : memref<1x128xf32, #tpu.memory_space<vmem>>, vector<1x128xf32>
    %22 = vector.broadcast %21 : vector<1x128xf32> to vector<8x128xf32>
    %23 = arith.addf %20, %22 : vector<8x128xf32>
    %c0_22 = arith.constant 0 : index
    %c0_23 = arith.constant 0 : index
    %24 = vector.load %arg10[%c0_22, %c0_23] : memref<8x128xf32, #tpu.memory_space<vmem>>, vector<8x128xf32>
    tpu.vector_store %arg10[%c0_22, %c0_23], %23 {strides = array<i32>} : memref<8x128xf32, #tpu.memory_space<vmem>>, vector<8x128xf32>,
    return
  }
  func.func @transform_0(%arg0: i32) -> (i32, i32) {
    %c0_i32 = arith.constant 0 : i32
    %c0_i32_0 = arith.constant 0 : i32
    return %arg0, %c0_i32 : i32, i32
  }
  func.func @transform_1(%arg0: i32) -> (i32, i32) {
    %c0_i32 = arith.constant 0 : i32
    %c0_i32_0 = arith.constant 0 : i32
    return %arg0, %c0_i32 : i32, i32
  }
  func.func @transform_2(%arg0: i32) -> (i32, i32) {
    %c0_i32 = arith.constant 0 : i32
    %c0_i32_0 = arith.constant 0 : i32
    %c0_i32_1 = arith.constant 0 : i32
    return %c0_i32, %c0_i32_0 : i32, i32
  }
  func.func @transform_3(%arg0: i32) -> (i32, i32) {
    %c0_i32 = arith.constant 0 : i32
    %c0_i32_0 = arith.constant 0 : i32
    %c0_i32_1 = arith.constant 0 : i32
    return %c0_i32, %c0_i32_0 : i32, i32
  }
  func.func @transform_4(%arg0: i32) -> (i32, i32) {
    %c0_i32 = arith.constant 0 : i32
    %c0_i32_0 = arith.constant 0 : i32
    %c0_i32_1 = arith.constant 0 : i32
    return %c0_i32, %c0_i32_0 : i32, i32
  }
  func.func @transform_5(%arg0: i32) -> (i32, i32) {
    %c0_i32 = arith.constant 0 : i32
    %c0_i32_0 = arith.constant 0 : i32
    %c0_i32_1 = arith.constant 0 : i32
    return %c0_i32, %c0_i32_0 : i32, i32
  }
  func.func @transform_6(%arg0: i32) -> (i32, i32) {
    %c0_i32 = arith.constant 0 : i32
    %c0_i32_0 = arith.constant 0 : i32
    %c0_i32_1 = arith.constant 0 : i32
    return %c0_i32, %c0_i32_0 : i32, i32
  }
  func.func @transform_7(%arg0: i32) -> (i32, i32) {
    %c0_i32 = arith.constant 0 : i32
    %c0_i32_0 = arith.constant 0 : i32
    %c0_i32_1 = arith.constant 0 : i32
    return %c0_i32, %c0_i32_0 : i32, i32
  }
  func.func @transform_8(%arg0: i32) -> (i32, i32) {
    %c0_i32 = arith.constant 0 : i32
    %c0_i32_0 = arith.constant 0 : i32
    %c0_i32_1 = arith.constant 0 : i32
    return %c0_i32, %c0_i32_0 : i32, i32
  }
  func.func @transform_9(%arg0: i32) -> (i32, i32) {
    %c0_i32 = arith.constant 0 : i32
    %c0_i32_0 = arith.constant 0 : i32
    return %arg0, %c0_i32 : i32, i32
  }
}

</mosaic_0001>

<bundles_post_ra>
// kernel: critic_forward.1
= control target key start
LH: loop header
LB: loop body
LE: loop exit
PB: predicated region body
PF: predicated region fallthrough
CT: control target
= control target key end

     0   :  { %vm41_vm0 = vcmask 1043456   ;;  %vm37_vm1 = vcmask 31744   ;;  %vm65_vm2 = vcmask 97280   ;;  %s364_s2 = inlined_call_operand.vmem [shape: f32[12,128], index: 2, kind: input, shape index: {}]   ;;  %s365_s3 = inlined_call_operand.vmem [shape: f32[4,128], index: 3, kind: input, shape index: {}]   ;;  %s366_s1 = inlined_call_operand.vmem [shape: f32[8,4], index: 1, kind: input, shape index: {}]   ;;  %s367_s0 = inlined_call_operand.vmem [shape: f32[8,12], index: 0, kind: input, shape index: {}]   ;;  %s368_s5 = inlined_call_operand.vmem [shape: f32[128,128], index: 5, kind: input, shape index: {}]   ;;  %s369_s4 = inlined_call_operand.vmem [shape: f32[1,128], index: 4, kind: input, shape index: {}]   ;;  %s370_s6 = inlined_call_operand.vmem [shape: f32[1,128], index: 6, kind: input, shape index: {}]   ;;  %s371_s7 = inlined_call_operand.vmem [shape: f32[128,128], index: 7, kind: input, shape index: {}]   ;;  %s372_s8 = inlined_call_operand.vmem [shape: f32[1,128], index: 8, kind: input, shape index: {}]   ;;  %s373_s9 = inlined_call_operand.vmem [shape: f32[8,128], index: 9, kind: output, shape index: {}]  }
   0x1   :  { %v34_v0 = vld [vmem:[%s364_s2 + $0x8] sm:$0xf]  ;;  %v36_v1 = vld [vmem:[%s365_s3] sm:$0xf]  ;;  %v113_v5 = vld [vmem:[%s368_s5 + $0x78] sm:$0xff] }
   0x2   :  { %v33_v2 = vld [vmem:[%s364_s2] sm:$0xff]  ;;  %186 = vmatpush.msk.msra.mxu1 %vm41_vm0, %v34_v0  ;;  %184 = vmatpush.msk.msra.mxu0 %vm41_vm0, %v36_v1  ;;  %v112_v6 = vld [vmem:[%s368_s5 + $0x70] sm:$0xff]  ;;  %v111_v7 = vld [vmem:[%s368_s5 + $0x68] sm:$0xff] }
   0x3   :  { %v35_v3 = vld [vmem:[%s366_s1] sm:$0xff]  ;;  %118 = vmatpush.msra.mxu2 %v113_v5  ;;  %v109_v9 = vld [vmem:[%s368_s5 + $0x58] sm:$0xff]  ;;  %v108_v10 = vld [vmem:[%s368_s5 + $0x50] sm:$0xff] }
   0x4   :  { %v32_v4 = vld [vmem:[%s367_s0] sm:$0xff]  ;;  %185 = vmatmul.msk.f32.vlgmr.msra.gmra.mxu0 %vm37_vm1, %v35_v3  ;;  %87 = vmatpush.msra.mxu1 %v33_v2  ;;  %v107_v11 = vld [vmem:[%s368_s5 + $0x48] sm:$0xff]  ;;  %v105_v13 = vld [vmem:[%s368_s5 + $0x38] sm:$0xff] }
   0x5   :  { %187 = vmatmul.msk.f32.vlgmr.msra.gmra.mxu1 %vm65_vm2, %v32_v4  ;;  %119 = vmatpush.msra.mxu2 %v112_v6  ;;  %v110_v8 = vld [vmem:[%s368_s5 + $0x60] sm:$0xff]  ;;  %v104_v14 = vld [vmem:[%s368_s5 + $0x30] sm:$0xff]  ;;  %v103_v15 = vld [vmem:[%s368_s5 + $0x28] sm:$0xff] }
   0x6   :  { %v106_v12 = vld [vmem:[%s368_s5 + $0x40] sm:$0xff]  ;;  %v101_v17 = vld [vmem:[%s368_s5 + $0x18] sm:$0xff]  ;;  %v100_v18 = vld [vmem:[%s368_s5 + $0x10] sm:$0xff] }
   0x7   :  { %120 = vmatpush.msra.mxu2 %v111_v7  ;;  %v102_v16 = vld [vmem:[%s368_s5 + $0x20] sm:$0xff]  ;;  %v99_v19 = vld [vmem:[%s368_s5 + $0x8] sm:$0xff]  ;;  %v154_v21 = vld [vmem:[%s371_s7 + $0x78] sm:$0xff] }
   0x8   :  { %v98_v20 = vld [vmem:[%s368_s5] sm:$0xff]  ;;  %v153_v22 = vld [vmem:[%s371_s7 + $0x70] sm:$0xff]  ;;  %159 = vmatpush.msra.mxu3 %v154_v21  ;;  %v152_v23 = vld [vmem:[%s371_s7 + $0x68] sm:$0xff] }
   0x9   :  { %121 = vmatpush.msra.mxu2 %v110_v8  ;;  %v151_v24 = vld [vmem:[%s371_s7 + $0x60] sm:$0xff]  ;;  %v150_v25 = vld [vmem:[%s371_s7 + $0x58] sm:$0xff]  ;;  %v149_v26 = vld [vmem:[%s371_s7 + $0x50] sm:$0xff] }
   0xa   :  { %160 = vmatpush.msra.mxu3 %v153_v22  ;;  %v148_v27 = vld [vmem:[%s371_s7 + $0x48] sm:$0xff]  ;;  %v147_v28 = vld [vmem:[%s371_s7 + $0x40] sm:$0xff]  ;;  %v146_v29 = vld [vmem:[%s371_s7 + $0x38] sm:$0xff] }
   0xb   :  { %122 = vmatpush.msra.mxu2 %v109_v9  ;;  %v145_v30 = vld [vmem:[%s371_s7 + $0x30] sm:$0xff]  ;;  %v144_v31 = vld [vmem:[%s371_s7 + $0x28] sm:$0xff]  ;;  %v143_v32 = vld [vmem:[%s371_s7 + $0x20] sm:$0xff] }
   0xc   :  { %161 = vmatpush.msra.mxu3 %v152_v23  ;;  %v142_v33 = vld [vmem:[%s371_s7 + $0x18] sm:$0xff]  ;;  %v188_v35 = vld [vmem:[%s369_s4] ss:$0 sm:$0xff]  ;;  %v141_v40 = vld [vmem:[%s371_s7 + $0x10] sm:$0xff] }
   0xd   :  { %123 = vmatpush.msra.mxu2 %v108_v10  ;;  %v140_v41 = vld [vmem:[%s371_s7 + $0x8] sm:$0xff]  ;;  %v139_v42 = vld [vmem:[%s371_s7] sm:$0xff] }
   0xe   :  { %162 = vmatpush.msra.mxu3 %v151_v24  ;;  %v189_v43 = vld [vmem:[%s370_s6] ss:$0 sm:$0xff] }
   0xf   :  { %124 = vmatpush.msra.mxu2 %v107_v11  ;;  %v190_v47 = vld [vmem:[%s372_s8] ss:$0 sm:$0xff] }
  0x10   :  { %163 = vmatpush.msra.mxu3 %v150_v25 }
  0x11   :  { %125 = vmatpush.msra.mxu2 %v106_v12 }
  0x12   :  { %164 = vmatpush.msra.mxu3 %v149_v26 }
  0x13   :  { %126 = vmatpush.msra.mxu2 %v105_v13 }
  0x14   :  { %165 = vmatpush.msra.mxu3 %v148_v27 }
  0x15   :  { %127 = vmatpush.msra.mxu2 %v104_v14 }
  0x16   :  { %166 = vmatpush.msra.mxu3 %v147_v28 }
  0x17   :  { %128 = vmatpush.msra.mxu2 %v103_v15 }
  0x18   :  { %167 = vmatpush.msra.mxu3 %v146_v29 }
  0x19   :  { %129 = vmatpush.msra.mxu2 %v102_v16 }
  0x1a   :  { %168 = vmatpush.msra.mxu3 %v145_v30 }
  0x1b   :  { %130 = vmatpush.msra.mxu2 %v101_v17 }
  0x1c   :  { %169 = vmatpush.msra.mxu3 %v144_v31 }
  0x1d   :  { %131 = vmatpush.msra.mxu2 %v100_v18 }
  0x1e   :  { %170 = vmatpush.msra.mxu3 %v143_v32 }
  0x1f   :  { %132 = vmatpush.msra.mxu2 %v99_v19 }
  0x20   :  { %171 = vmatpush.msra.mxu3 %v142_v33 }
  0x21   :  { %133 = vmatpush.msra.mxu2 %v98_v20 }
  0x22   :  { %172 = vmatpush.msra.mxu3 %v141_v40 }
  0x24   :  { %173 = vmatpush.msra.mxu3 %v140_v41 }
  0x26   :  { %174 = vmatpush.msra.mxu3 %v139_v42 }
  0x81   :  { %v62_v34 = vpop.f32.mrf.mxu0 }
  0x82   :  { %v89_v36 = vpop.f32.mrf.mxu1 }
  0x83   :  { %v90_v37 = vadd.f32 %v89_v36, %v62_v34 }
  0x85   :  { %v96_v38 = vadd.f32 %v188_v35, %v90_v37 }
  0x87   :  { %v97_v39 = vmax.f32 %v96_v38, 0.0 }
  0x89   :  { %134 = vmatmul.f32.vlgmr.msra.gmra.mxu2 %v97_v39 }
 0x10c   :  { %v135_v44 = vpop.f32.mrf.mxu2 }
 0x10d   :  { %v136_v45 = vadd.f32 %v189_v43, %v135_v44 }
 0x10f   :  { %v138_v46 = vmax.f32 %v136_v45, 0.0 }
 0x111   :  { %175 = vmatmul.f32.vlgmr.msra.gmra.mxu3 %v138_v46 }
 0x194   :  { %v176_v48 = vpop.f32.mrf.mxu3 }
 0x195   :  { %v177_v49 = vadd.f32 %v190_v47, %v176_v48 }
 0x197   :  { %179 = vst [vmem:[%s373_s9] sm:$0xff] %v177_v49 }

</bundles_post_ra>
